<compile_context>
chip_gen: v6e
topology: v6e:2x2x1
jax: 0.10.0
libtpu: 0.0.40
codegen_flags: <defaults>
</compile_context>

<pallas_src>
import functools

import jax
import jax.numpy as jnp
from jax.experimental import pallas as pl
from jax.experimental.pallas import tpu as pltpu

MARGIN = 0.3


def _triplet_loss_kernel(a_ref, p_ref, n_ref, out_ref, acc_ref, *,
                         tile_b, batch, margin):
    i = pl.program_id(0)

    @pl.when(i == 0)
    def _init():
        acc_ref[...] = jnp.zeros_like(acc_ref)

    a = a_ref[...].astype(jnp.float32)
    p = p_ref[...].astype(jnp.float32)
    n = n_ref[...].astype(jnp.float32)

    dp = a - p
    dn = a - n
    # fused single reduction over the feature dim: (a-p)^2 - (a-n)^2
    diff = dp * dp - dn * dn                                    # (TILE_B, D)
    per_row = jnp.sum(diff, axis=1, keepdims=True)              # (TILE_B, 1)
    hinge = jnp.maximum(per_row + margin, 0.0)                  # (TILE_B, 1)

    # mask rows of a partial last tile so padded rows contribute nothing
    row_idx = i * tile_b + jax.lax.broadcasted_iota(jnp.int32, hinge.shape, 0)
    hinge = jnp.where(row_idx < batch, hinge, 0.0)

    acc_ref[...] += jnp.sum(hinge, keepdims=True)               # (1, 1)

    @pl.when(i == pl.num_programs(0) - 1)
    def _finalize():
        # divide by the true batch size, not grid_steps * TILE_B
        out_ref[...] = acc_ref[...] * (1.0 / batch)


def _choose_tile_b(batch, d, itemsize, budget_bytes=8 * 1024 * 1024):
    # 3 inputs x 2 pipeline buffers of (tile_b, d) must fit the VMEM budget.
    tb = budget_bytes // (3 * 2 * d * itemsize)
    tb = max(8, (tb // 8) * 8)           # (8, 128) sublane constraint
    b_pad = ((batch + 7) // 8) * 8
    return int(min(tb, 1024, b_pad))


def triplet_loss(anchor, positive, negative, margin=MARGIN, tile_b=None):
    assert anchor.shape == positive.shape == negative.shape
    assert anchor.ndim == 2
    B, D = anchor.shape
    itemsize = jnp.dtype(anchor.dtype).itemsize
    if tile_b is None:
        tile_b = _choose_tile_b(B, D, itemsize)
    assert tile_b % 8 == 0

    grid = (pl.cdiv(B, tile_b),)
    in_spec = pl.BlockSpec((tile_b, D), lambda i: (i, 0))

    kernel = functools.partial(
        _triplet_loss_kernel, tile_b=tile_b, batch=B, margin=float(margin))

    out = pl.pallas_call(
        kernel,
        out_shape=jax.ShapeDtypeStruct((1, 1), jnp.float32),
        grid_spec=pltpu.PrefetchScalarGridSpec(
            num_scalar_prefetch=0,
            grid=grid,
            in_specs=[in_spec, in_spec, in_spec],
            out_specs=pl.BlockSpec((1, 1), lambda i: (0, 0)),
            scratch_shapes=[pltpu.VMEM((1, 1), jnp.float32)],
        ),
        compiler_params=pltpu.CompilerParams(
            dimension_semantics=("arbitrary",),   # accumulation axis
            vmem_limit_bytes=32 * 1024 * 1024,
        ),
        cost_estimate=pl.CostEstimate(
            flops=7 * B * D,
            transcendentals=0,
            bytes_accessed=3 * B * D * itemsize + 4,
        ),
    )(anchor, positive, negative)
    return out[0, 0]


def triplet_loss_ref(anchor, positive, negative, margin=MARGIN):
    pos_dist = jnp.sum((anchor - positive) ** 2, axis=1)
    neg_dist = jnp.sum((anchor - negative) ** 2, axis=1)
    loss = jnp.maximum(pos_dist - neg_dist + margin, 0.0)
    return jnp.mean(loss)


if __name__ == "__main__":
    key = jax.random.PRNGKey(0)
    k_a, k_p, k_n = jax.random.split(key, 3)

    # small batch of embedding vectors; B chosen so the last tile is partial
    B, D = 20, 32
    anchor = jax.random.normal(k_a, (B, D), dtype=jnp.float32)
    positive = jax.random.normal(k_p, (B, D), dtype=jnp.float32)
    negative = jax.random.normal(k_n, (B, D), dtype=jnp.float32)

    ref = triplet_loss_ref(anchor, positive, negative)

    # exercise the multi-tile path (grid of 3, masked partial last tile)
    out_tiled = jax.block_until_ready(
        triplet_loss(anchor, positive, negative, tile_b=8))
    assert jnp.allclose(out_tiled, ref, rtol=1e-5, atol=1e-5), (out_tiled, ref)

    # and the auto-sized tile path (single tile for these small shapes)
    out_auto = jax.block_until_ready(triplet_loss(anchor, positive, negative))
    assert jnp.allclose(out_auto, ref, rtol=1e-5, atol=1e-5), (out_auto, ref)

    print("KERNEL_OK")
</pallas_src>

<mosaic_0001>
module attributes {stable_mosaic.version = 11 : i64} {
  func.func @_triplet_loss_kernel(%arg0: i32, %arg1: memref<8x32xf32, #tpu.memory_space<vmem>>, %arg2: memref<8x32xf32, #tpu.memory_space<vmem>>, %arg3: memref<8x32xf32, #tpu.memory_space<vmem>>, %arg4: memref<1x1xf32, #tpu.memory_space<vmem>>, %arg5: memref<1x1xf32, #tpu.memory_space<vmem>>) attributes {dimension_semantics = [#tpu.dimension_semantics<arbitrary>], iteration_bounds = array<i64: 3>, scalar_prefetch = 0 : i64, scratch_operands = 1 : i64, tpu.core_type = #tpu.core_type<tc>, window_params = [{transform_indices = @transform_0, window_bounds = array<i64: 8, 32>}, {transform_indices = @transform_1, window_bounds = array<i64: 8, 32>}, {transform_indices = @transform_2, window_bounds = array<i64: 8, 32>}, {pipeline_mode = #tpu.pipeline_mode<synchronous>, transform_indices = @transform_3, window_bounds = array<i64: 1, 1>}]} {
    %c0_i32 = arith.constant 0 : i32
    %0 = arith.cmpi eq, %arg0, %c0_i32 : i32
    %1 = arith.extui %0 : i1 to i32
    %c0_i32_0 = arith.constant 0 : i32
    %2 = arith.cmpi ne, %1, %c0_i32_0 : i32
    scf.if %2 {
      %cst_15 = arith.constant 0.000000e+00 : f32
      %36 = vector.broadcast %cst_15 : f32 to vector<1x1xf32>
      %c0_16 = arith.constant 0 : index
      %c0_17 = arith.constant 0 : index
      %37 = vector.load %arg5[%c0_16, %c0_17] : memref<1x1xf32, #tpu.memory_space<vmem>>, vector<1x1xf32>
      tpu.vector_store %arg5[%c0_16, %c0_17], %36 {strides = array<i32>} : memref<1x1xf32, #tpu.memory_space<vmem>>, vector<1x1xf32>,
    } else {
    }
    %c0 = arith.constant 0 : index
    %c0_1 = arith.constant 0 : index
    %3 = vector.load %arg1[%c0, %c0_1] : memref<8x32xf32, #tpu.memory_space<vmem>>, vector<8x32xf32>
    %c0_2 = arith.constant 0 : index
    %c0_3 = arith.constant 0 : index
    %4 = vector.load %arg2[%c0_2, %c0_3] : memref<8x32xf32, #tpu.memory_space<vmem>>, vector<8x32xf32>
    %c0_4 = arith.constant 0 : index
    %c0_5 = arith.constant 0 : index
    %5 = vector.load %arg3[%c0_4, %c0_5] : memref<8x32xf32, #tpu.memory_space<vmem>>, vector<8x32xf32>
    %6 = arith.subf %3, %4 : vector<8x32xf32>
    %7 = arith.subf %3, %5 : vector<8x32xf32>
    %8 = arith.mulf %6, %6 : vector<8x32xf32>
    %9 = arith.mulf %7, %7 : vector<8x32xf32>
    %10 = arith.subf %8, %9 : vector<8x32xf32>
    %cst = arith.constant dense<0.000000e+00> : vector<8xf32>
    %11 = vector.multi_reduction <add>, %10, %cst [1] : vector<8x32xf32> to vector<8xf32>
    %12 = vector.shape_cast %11 : vector<8xf32> to vector<8x1xf32>
    %cst_6 = arith.constant 3.000000e-01 : f32
    %13 = vector.broadcast %cst_6 : f32 to vector<8x1xf32>
    %14 = arith.addf %12, %13 : vector<8x1xf32>
    %cst_7 = arith.constant 0.000000e+00 : f32
    %15 = vector.broadcast %cst_7 : f32 to vector<8x1xf32>
    %16 = arith.maximumf %14, %15 : vector<8x1xf32>
    %c8_i32 = arith.constant 8 : i32
    %17 = arith.muli %arg0, %c8_i32 : i32
    %18 = tpu.iota {dimensions = array<i32: 0>} : vector<8x1xi32>
    %19 = vector.broadcast %17 : i32 to vector<8x1xi32>
    %20 = arith.addi %19, %18 : vector<8x1xi32>
    %c20_i32 = arith.constant 20 : i32
    %21 = vector.broadcast %c20_i32 : i32 to vector<8x1xi32>
    %22 = arith.cmpi slt, %20, %21 : vector<8x1xi32>
    %cst_8 = arith.constant 0.000000e+00 : f32
    %23 = vector.broadcast %cst_8 : f32 to vector<8x1xf32>
    %24 = arith.select %22, %16, %23 : vector<8x1xi1>, vector<8x1xf32>
    %c0_9 = arith.constant 0 : index
    %c0_10 = arith.constant 0 : index
    %25 = vector.load %arg5[%c0_9, %c0_10] : memref<1x1xf32, #tpu.memory_space<vmem>>, vector<1x1xf32>
    %26 = vector.shape_cast %24 : vector<8x1xf32> to vector<1x8x1xf32>
    %cst_11 = arith.constant dense<0.000000e+00> : vector<1xf32>
    %27 = vector.multi_reduction <add>, %26, %cst_11 [1, 2] : vector<1x8x1xf32> to vector<1xf32>
    %28 = vector.shape_cast %27 : vector<1xf32> to vector<1x1x1xf32>
    %29 = vector.extract %28[0, 0, 0] : f32 from vector<1x1x1xf32>
    %30 = vector.broadcast %29 : f32 to vector<1x1xf32>
    %31 = arith.addf %25, %30 : vector<1x1xf32>
    %c0_12 = arith.constant 0 : index
    %c0_13 = arith.constant 0 : index
    %32 = vector.load %arg5[%c0_12, %c0_13] : memref<1x1xf32, #tpu.memory_space<vmem>>, vector<1x1xf32>
    tpu.vector_store %arg5[%c0_12, %c0_13], %31 {strides = array<i32>} : memref<1x1xf32, #tpu.memory_space<vmem>>, vector<1x1xf32>,
    %c2_i32 = arith.constant 2 : i32
    %33 = arith.cmpi eq, %arg0, %c2_i32 : i32
    %34 = arith.extui %33 : i1 to i32
    %c0_i32_14 = arith.constant 0 : i32
    %35 = arith.cmpi ne, %34, %c0_i32_14 : i32
    scf.if %35 {
      %c0_15 = arith.constant 0 : index
      %c0_16 = arith.constant 0 : index
      %36 = vector.load %arg5[%c0_15, %c0_16] : memref<1x1xf32, #tpu.memory_space<vmem>>, vector<1x1xf32>
      %cst_17 = arith.constant 5.000000e-02 : f32
      %37 = vector.broadcast %cst_17 : f32 to vector<1x1xf32>
      %38 = arith.mulf %36, %37 : vector<1x1xf32>
      %c0_18 = arith.constant 0 : index
      %c0_19 = arith.constant 0 : index
      %39 = vector.load %arg4[%c0_18, %c0_19] : memref<1x1xf32, #tpu.memory_space<vmem>>, vector<1x1xf32>
      tpu.vector_store %arg4[%c0_18, %c0_19], %38 {strides = array<i32>} : memref<1x1xf32, #tpu.memory_space<vmem>>, vector<1x1xf32>,
    } else {
    }
    return
  }
  func.func @transform_0(%arg0: i32) -> (i32, i32) {
    %c0_i32 = arith.constant 0 : i32
    %c0_i32_0 = arith.constant 0 : i32
    return %arg0, %c0_i32 : i32, i32
  }
  func.func @transform_1(%arg0: i32) -> (i32, i32) {
    %c0_i32 = arith.constant 0 : i32
    %c0_i32_0 = arith.constant 0 : i32
    return %arg0, %c0_i32 : i32, i32
  }
  func.func @transform_2(%arg0: i32) -> (i32, i32) {
    %c0_i32 = arith.constant 0 : i32
    %c0_i32_0 = arith.constant 0 : i32
    return %arg0, %c0_i32 : i32, i32
  }
  func.func @transform_3(%arg0: i32) -> (i32, i32) {
    %c0_i32 = arith.constant 0 : i32
    %c0_i32_0 = arith.constant 0 : i32
    %c0_i32_1 = arith.constant 0 : i32
    return %c0_i32, %c0_i32_0 : i32, i32
  }
}

</mosaic_0001>

<bundles_post_ra>
// kernel: tpu_custom_call.1
= control target key start
LH: loop header
LB: loop body
LE: loop exit
PB: predicated region body
PF: predicated region fallthrough
CT: control target
= control target key end

     0   :  { %8 = vsyncpa [#allocation4], 0  ;;  %s835_s0 = inlined_call_operand.hbm [shape: f32[20,32], index: 0, kind: input, shape index: {}]   ;;  %s836_s1 = inlined_call_operand.hbm [shape: f32[20,32], index: 1, kind: input, shape index: {}]   ;;  %s837_s2 = inlined_call_operand.hbm [shape: f32[20,32], index: 2, kind: input, shape index: {}]   ;;  %s838_s3 = inlined_call_operand.hbm [shape: f32[1,1], index: 3, kind: output, shape index: {}]  }
   0x1   :  { %10 = vsyncpa [#allocation4 + $0x1], 0 }
   0x2   :  { %11 = vsyncpa [#allocation7], 0 }
   0x3   :  { %13 = vsyncpa [#allocation7 + $0x1], 0 }
   0x4   :  { %14 = vsyncpa [#allocation5], 0  ;;  %s651_s12 = smov 0   ;;  %s653_s13 = smov 0  }
   0x5   :  { %s655_s14 = smov 0   ;;  %s657_s15 = smov 0  }
   0x6 LB: > { %s670_s16 = sadd.s32 4294967295, %s624_s15   ;;  %s673_s17 = sadd.s32 1, %s624_s15   ;;  %s624_s15 = sphi %s657_s15, %s851_s15   ;;  %s620_s14 = sphi %s655_s14, %s850_s14   ;;  %s616_s13 = sphi %s653_s13, %s849_s13   ;;  %s612_s12 = sphi %s651_s12, %s848_s12  }
   0x7   : > { %s24_s18 = ssub.s32 %s624_s15, %s673_s17  ;;  %s27_s19 = sadd.s32 1, %s620_s14 }
   0x8   : > { %p25_p0 = scmp.eq.s32.totalorder %s24_s18, 0  ;;  %p34_p1 = scmp.ne.s32.totalorder %s620_s14, %s616_s13 }
   0x9   : > { %p35_p2 = scmp.eq.s32.totalorder %s624_s15, 0  ;;  %p40_p3 = scmp.ne.s32.totalorder %s616_s13, %s612_s12 }
   0xa   : > { %s683_s20 = scalar_select %p25_p0, %s620_s14, %s27_s19  }
   0xb   : > { %p36_p4 = por %p35_p2, %p34_p1  ;;  %p41_p5 = scmp.eq.s32.totalorder %s670_s16, 0 }
   0xc   : > { %p437_p6 = scmp.lt.s32.totalorder %s624_s15, 3  ;;  %s137_s22 = sand.u32 1, %s620_s14  }
   0xd   : > { %p687_p7 = por %p41_p5, %p40_p3  ;;  %s694_s23 = sshll.u32 %s137_s22, 3 }
   0xe   : > { %s697_s24 = sshll.u32 %s624_s15, 7  ;;  %p699_p8 = pnand %p437_p6, %p36_p4 }
   0xf   : > { %s840_s21 = scalar_select %p687_p7, 1, 0 }
  0x10   : > { %s155_s26 = sand.u32 1, %s624_s15   ;;  %s708_s29 = scalar_lea.hbm %s836_s1, %s697_s24 }
  0x11   : > { %s159_s30 = scalar_lea.vmem [#allocation6], %s694_s23  ;;  %s713_s5 = scalar_lea.sflag [#allocation7], %s155_s26 }
  0x12   : > { %s166_s4 = sshll.u32 %s159_s30, 4  ;;  %s474_s6 = scalar_lea.hbm %s708_s29, 128  ;;  %s167_s4 = int_to_ptr.vmem [resolvable:$true] %s166_s4 }
  0x13   : > { %p475_p11 = scmp.ne.s32.totalorder %s708_s29, %s474_s6  ;;  %p719_p12 = pneg %p699_p8 }
  0x14   : > { %s479_s10 = scalar_lea.hbm %s836_s1, 384  ;;  %p480_p1 = scmp.lt.s32.totalorder %s708_s29, %s836_s1 }
  0x15   : > { %p477_p13 = pnand %p719_p12, %p475_p11  ;;  %p481_p2 = scmp.lt.s32.totalorder %s479_s10, %s474_s6 }
  0x17   : > { %p478_p0 = pneg %p477_p13  ;;  %p482_p3 = por %p481_p2, %p480_p1 }
  0x19   : > { %p483_p4 = pnand %p482_p3, %p478_p0 }
  0x1b   : > { %486 = shalt.err (!%p483_p4)
}
  0x1c   : > { %s487_s18 = scalar_lea.vmem %s167_s4, 128  ;;  %s626_s19 = smov [#allocation6]  }
  0x1d   : > { %p488_p5 = scmp.ne.s32.totalorder %s167_s4, %s487_s18  ;;  %s492_s26 = sshll.u32 %s626_s19, 4  ;;  %s493_s26 = int_to_ptr.vmem [resolvable:$false] %s492_s26 }
  0x1e   : > { %s494_s27 = scalar_lea.vmem %s493_s26, 256  ;;  %p495_p11 = scmp.lt.s32.totalorder %s167_s4, %s493_s26 }
  0x1f   : > { %p490_p6 = pnand %p488_p5, %p719_p12  ;;  %p496_p13 = scmp.lt.s32.totalorder %s494_s27, %s487_s18 }
  0x21   : > { %p491_p9 = pneg %p490_p6  ;;  %p497_p10 = por %p496_p13, %p495_p11 }
  0x23   : > { %p498_p7 = pnand %p497_p10, %p491_p9 }
  0x25   : > { %501 = shalt.err (!%p498_p7)
}
  0x26   : > { %433 = dma.hbm_to_vmem [thread:$0]  (!%p699_p8), %s708_s29, 128, %s167_s4, %s713_s5  }
  0x27   : > { %p843_p0 = scmp.lt.s32.totalorder %s624_s15, 4  ;;  %p844_p1 = scmp.ge.s32.totalorder %s624_s15, 1 }
  0x28   : > { %s750_s8 = scalar_lea.hbm %s835_s0, %s697_s24  ;;  %s141_s9 = scalar_lea.vmem [#allocation3], %s694_s23 }
  0x29   : > { %p742_p2 = pnand %p844_p1, %p843_p0  ;;  %s148_s10 = sshll.u32 %s141_s9, 4  ;;  %s149_s10 = int_to_ptr.vmem [resolvable:$true] %s148_s10 }
  0x2a   : > { %s757_s29 = scalar_lea.hbm %s837_s2, %s697_s24  ;;  %s138_s15 = scalar_lea.sflag [#allocation4], %s137_s22 }
  0x2b   : > { %s845_s28 = scalar_select %p742_p2, 1, 0 }
  0x2c   : > { %s502_s4 = scalar_lea.hbm %s750_s8, 128  ;;  %s507_s26 = scalar_lea.hbm %s835_s0, 384 }
  0x2d   : > { %p503_p7 = scmp.ne.s32.totalorder %s750_s8, %s502_s4  ;;  %p508_p3 = scmp.lt.s32.totalorder %s750_s8, %s835_s0 }
  0x2e   : > { %p509_p4 = scmp.lt.s32.totalorder %s507_s26, %s502_s4 }
  0x2f   : > { %p505_p9 = pnand %p503_p7, %p719_p12 }
  0x30   : > { %p510_p5 = por %p509_p4, %p508_p3 }
  0x31   : > { %p506_p10 = pneg %p505_p9 }
  0x33   : > { %p511_p6 = pnand %p510_p5, %p506_p10 }
  0x35   : > { %514 = shalt.err (!%p511_p6)
}
  0x36   : > { %s515_s24 = scalar_lea.vmem %s149_s10, 128  ;;  %s627_s22 = smov [#allocation3]  }
  0x37   : > { %p516_p11 = scmp.ne.s32.totalorder %s149_s10, %s515_s24  ;;  %s520_s6 = sshll.u32 %s627_s22, 4  ;;  %s521_s6 = int_to_ptr.vmem [resolvable:$false] %s520_s6 }
  0x38   : > { %s522_s9 = scalar_lea.vmem %s521_s6, 256  ;;  %p523_p1 = scmp.lt.s32.totalorder %s149_s10, %s521_s6 }
  0x39   : > { %p518_p13 = pnand %p516_p11, %p719_p12  ;;  %p524_p7 = scmp.lt.s32.totalorder %s522_s9, %s515_s24 }
  0x3b   : > { %p519_p0 = pneg %p518_p13  ;;  %p525_p9 = por %p524_p7, %p523_p1 }
  0x3d   : > { %p526_p2 = pnand %p525_p9, %p519_p0 }
  0x3f   : > { %529 = shalt.err (!%p526_p2)
}
  0x40   : > { %430 = dma.hbm_to_vmem [thread:$0]  (!%p699_p8), %s750_s8, 128, %s149_s10, %s138_s15  }
  0x41   : > { %s177_s11 = scalar_lea.vmem [#allocation8], %s694_s23  ;;  %s530_s4 = scalar_lea.hbm %s757_s29, 128 }
  0x42   : > { %s184_s12 = sshll.u32 %s177_s11, 4  ;;  %p531_p10 = scmp.ne.s32.totalorder %s757_s29, %s530_s4  ;;  %s185_s12 = int_to_ptr.vmem [resolvable:$true] %s184_s12 }
  0x43   : > { %s535_s26 = scalar_lea.hbm %s837_s2, 384  ;;  %p536_p2 = scmp.lt.s32.totalorder %s757_s29, %s837_s2 }
  0x44   : > { %p533_p3 = pnand %p531_p10, %p719_p12  ;;  %p537_p5 = scmp.lt.s32.totalorder %s535_s26, %s530_s4 }
  0x46   : > { %p534_p4 = pneg %p533_p3  ;;  %p538_p6 = por %p537_p5, %p536_p2 }
  0x48   : > { %p539_p11 = pnand %p538_p6, %p534_p4 }
  0x4a   : > { %542 = shalt.err (!%p539_p11)
}
  0x4b   : > { %s543_s23 = scalar_lea.vmem %s185_s12, 128  ;;  %s628_s8 = smov [#allocation8]  }
  0x4c   : > { %p544_p13 = scmp.ne.s32.totalorder %s185_s12, %s543_s23  ;;  %s548_s10 = sshll.u32 %s628_s8, 4  ;;  %s549_s10 = int_to_ptr.vmem [resolvable:$false] %s548_s10 }
  0x4d   : > { %s550_s15 = scalar_lea.vmem %s549_s10, 256  ;;  %p551_p7 = scmp.lt.s32.totalorder %s185_s12, %s549_s10 }
  0x4e   : > { %p546_p0 = pnand %p544_p13, %p719_p12  ;;  %p552_p9 = scmp.lt.s32.totalorder %s550_s15, %s543_s23 }
  0x50   : > { %p547_p1 = pneg %p546_p0  ;;  %p553_p10 = por %p552_p9, %p551_p7 }
  0x52   : > { %p554_p3 = pnand %p553_p10, %p547_p1 }
  0x54   : > { %557 = shalt.err (!%p554_p3)
}
  0x55   : > { %436 = dma.hbm_to_vmem [thread:$0]  (!%p699_p8), %s757_s29, 128, %s185_s12, %s713_s5  }
  0x56   : > { %p846_p4 = scmp.ne.s32.totalorder %s845_s28, 0 }
  0x57   : > { %s195_s7 = sand.u32 (!%p846_p4), 1, %s616_s13   ;;  %p847_p12 = scmp.ne.s32.totalorder (!%p846_p4), %s840_s21, 0 }
  0x58   : > { %193 = sbr.rel (%p846_p4) target bundleno = 488 (0x1e8), region = 32  ;;  %s405_s24 = sshll.u32 (!%p846_p4), %s195_s7, 3 }
  0x59   : > { %s196_s22 = scalar_lea.sflag (!%p846_p4), [#allocation4], %s195_s7  ;;  %s199_s6 = scalar_lea.vmem (!%p846_p4), [#allocation3], %s405_s24 }
  0x5d   : > { %599 = dma.done.wait (%p847_p12), %s196_s22, 128  }
  0x5e   : > { %601 = vsyncadd (%p847_p12), %s196_s22, 4294967168  ;;  %s204_s25 = sand.u32 1, %s670_s16   ;;  %s208_s11 = scalar_lea.vmem [#allocation6], %s405_s24 }
  0x5f   : > { %s205_s9 = scalar_lea.sflag [#allocation7], %s204_s25 }
  0x60   : > { %603 = dma.done.wait (%p847_p12), %s205_s9, 256  }
  0x61   : > { %605 = vsyncadd (%p847_p12), %s205_s9, 4294967040  ;;  %s217_s5 = scalar_lea.vmem [#allocation8], %s405_s24  ;;  %p408_p8 = scmp.ne.s32.totalorder %s670_s16, 0 }
  0x63   : > { %248 = sbr.rel (%p408_p8) target bundleno = 106 (0x6a), region = 48 }
  0x68   : > { %vm249_vm0 = vcmask 0   ;;  %v629_v0 = vmov 0.0  }
  0x69   : > { %250 = vst.msk [vmem:[#allocation2] sm:$0x1] %vm249_vm0, %v629_v0 }
  0x6a PF: > { %v251_v1 = vld [vmem:[%s199_s6] sm:$0xff]  ;;  %v252_v2 = vld [vmem:[%s208_s11] sm:$0xff]  ;;  %vm259_vm1 = vcmask 261120   ;;  %v266_v10 = vlaneseq  ;;  %s409_s21 = sshll.u32 %s670_s16, 3  ;;  %vm273_vm3 = vcmask 7168   ;;  %vm286_vm4 = vcmask 0  }
  0x6b   : > { %v253_v3 = vld [vmem:[%s217_s5] sm:$0xff]  ;;  %v254_v4 = vsub.f32 %v251_v1, %v252_v2  ;;  %v268_v12 = vstv %s409_s21  ;;  %p410_p2 = scmp.ne.s32.totalorder %s670_s16, 2 }
  0x6c   : > { %v255_v5 = vsub.f32 %v251_v1, %v253_v3  ;;  %v267_v11 = vshrl.u32 %v266_v10, 7 }
  0x6d   : > { %v256_v6 = vmul.f32 %v254_v4, %v254_v4 }
  0x6e   : > { %v257_v7 = vmul.f32 %v255_v5, %v255_v5  ;;  %v269_v13 = vadd.s32 %v268_v12, %v267_v11 }
  0x70   : > { %v258_v8 = vsub.f32 %v256_v6, %v257_v7  ;;  %vm270_vm2 = vcmp.lt.s32.totalorder %v269_v13, 20  ;;  %v272_v26 = vld [vmem:[#allocation2] sm:$0x1] }
  0x72   : > { %v260_v9 = vsel %vm259_vm1, %v258_v8, 0.0 }
  0x73   : > { %261 = vadd.xlane.f32.xlu0 %v260_v9 }
  0xfc   : > { %v262_v14 = vpop.xlane.xlu0 %261 }
  0xfd   : > { %v263_v15 = vadd.f32 0.3, %v262_v14 }
  0xff   : > { %v264_v16 = vmax.f32 %v263_v15, 0.0 }
 0x101   : > { %v271_v17 = vsel %vm270_vm2, %v264_v16, 0.0 }
 0x102   : > { %v274_v18 = vsel %vm273_vm3, %v271_v17, 0.0 }
 0x103   : > { %275 = vadd.xlane.f32.xlu0 %v274_v18 }
 0x18c   : > { %v276_v19 = vpop.xlane.xlu0 %275 }
 0x18d   : > { %v277_v20 = vrot.slane %v276_v19, 4 }
 0x18f   : > { %v278_v21 = vadd.f32 %v277_v20, %v276_v19 }
 0x191   : > { %v279_v22 = vrot.slane %v278_v21, 2 }
 0x193   : > { %v280_v23 = vadd.f32 %v279_v22, %v278_v21 }
 0x195   : > { %v281_v24 = vrot.slane %v280_v23, 1 }
 0x197   : > { %v282_v25 = vadd.f32 %v281_v24, %v280_v23 }
 0x199   : > { %415 = vpush %v282_v25 }
 0x1ca   : > { %s416_s28 = spop %415  ;;  %291 = sbr.rel (%p410_p2) target bundleno = 473 (0x1d9), region = 52 }
 0x1cb   : > { %v284_v27 = vstv %s416_s28 }
 0x1cc   : > { %v285_v28 = vadd.f32 %v284_v27, %v272_v26 }
 0x1ce   : > { %287 = vst.msk [vmem:[#allocation2] sm:$0x1] %vm286_vm4, %v285_v28 }
 0x1d5   : > { %v292_v29 = vld [vmem:[#allocation2] sm:$0x1] }
 0x1d6   : > { %v293_v30 = vmul.f32 0.05, %v292_v29 }
 0x1d8   : > { %294 = vst.msk [vmem:[#allocation9] sm:$0x1] %vm286_vm4, %v293_v30 }
 0x1d9 PF: > { %p438_p5 = scmp.eq.s32.totalorder %s670_s16, 2  ;;  %s630_s29 = smov [#allocation9]  }
 0x1da   : > { %s302_s12 = sshll.u32 %s630_s29, 4  ;;  %s303_s12 = int_to_ptr.vmem [resolvable:$true] %s302_s12 }
 0x1db   : > { %s558_s4 = scalar_lea.vmem %s303_s12, 16  ;;  %s564_s18 = scalar_lea.vmem %s303_s12, 32 }
 0x1dc   : > { %p559_p6 = scmp.ne.s32.totalorder %s303_s12, %s558_s4  ;;  %p565_p0 = scmp.lt.s32.totalorder %s303_s12, %s303_s12 }
 0x1dd   : > { %p566_p1 = scmp.lt.s32.totalorder %s564_s18, %s558_s4 }
 0x1de   : > { %p560_p11 = pnand %p559_p6, %p438_p5 }
 0x1df   : > { %p567_p7 = por %p566_p1, %p565_p0 }
 0x1e0   : > { %p561_p13 = pneg %p560_p11 }
 0x1e2   : > { %p568_p9 = pnand %p567_p7, %p561_p13 }
 0x1e4   : > { %571 = shalt.err (!%p568_p9)
}
 0x1e5   : > { %424 = dma.vmem_to_hbm [thread:$0]  (%p438_p5), %s303_s12, 16, %s838_s3, [#allocation5]  }
 0x1e6   : > { %607 = dma.done.wait (%p438_p5), [#allocation5], 16  }
 0x1e7   : > { %609 = vsyncadd (%p438_p5), [#allocation5], 4294967280 }
 0x1e8 PF: > { %p17_p10 = scmp.ge.s32.totalorder %s673_s17, 5   ;;  %s848_s12 = smov %s616_s13 }
 0x1e9   : > { %s849_s13 = smov %s620_s14  ;;  %s850_s14 = smov %s683_s20 }
 0x1ea   : > { %s851_s15 = smov %s673_s17  ;;  %19 = sbr.rel (!%p17_p10) target bundleno = 6 (0x6), region = 101 }
 0x1ef   :  { %315 = vsyncpa [#allocation4], 1 }
 0x1f0   :  { %317 = vsyncpa [#allocation4 + $0x1], 1 }
 0x1f1   :  { %318 = vsyncpa [#allocation7], 1 }
 0x1f2   :  { %320 = vsyncpa [#allocation7 + $0x1], 1 }
 0x1f3   :  { %321 = vsyncpa [#allocation5], 1 }
 0x1f4   :  { %323 = vsyncpa [#allocation5 + $0x1], 1 }

</bundles_post_ra>
